<compile_context>
chip_gen: v5e
topology: v5e:2x2
jax: 0.10.0
libtpu: 0.0.40
codegen_flags: <defaults>
</compile_context>

<pallas_src>
import jax
import jax.numpy as jnp
from jax.experimental import pallas as pl
from jax.experimental.pallas import tpu as pltpu


def _persistent_memory_kernel(mem_ref, out_ref):
    # mem_ref: (1, num_memories*dim)  -- resident parameter tile (lane-dense)
    # out_ref: (BB, num_memories*dim) -- BB batch rows of the flattened output
    out_ref[...] = jnp.broadcast_to(mem_ref[...], out_ref.shape)


def persistent_memory_forward(
    memories: jax.Array,
    batch_size: int,
    *,
    target_block_bytes: int = 2 * 1024 * 1024,
) -> jax.Array:
    """Broadcast the (num_memories, dim) parameter to (batch_size, num_memories, dim)."""
    num_memories, dim = memories.shape
    md = num_memories * dim
    itemsize = jnp.dtype(memories.dtype).itemsize
    bytes_per_row = md * itemsize

    # Batch rows per grid step: aim for ~target_block_bytes per output block.
    bb = max(1, target_block_bytes // bytes_per_row)
    if bb >= batch_size:
        # Whole output in one block (sublane dim == full array dim -> legal).
        bb = batch_size
    else:
        # Sublane dim of the block must be a multiple of 8 when it is not the
        # full array extent.
        bb = max(8, (bb // 8) * 8)

    # Lane-dense flattened layout: (batch, num_memories*dim).
    mem_flat = memories.reshape(1, md)

    out_flat = pl.pallas_call(
        _persistent_memory_kernel,
        out_shape=jax.ShapeDtypeStruct((batch_size, md), memories.dtype),
        grid_spec=pl.GridSpec(
            grid=(pl.cdiv(batch_size, bb),),
            in_specs=[
                # Constant index_map: the tiny parameter tile stays resident
                # in VMEM for every grid step (no re-DMA).
                pl.BlockSpec((1, md), lambda b: (0, 0)),
            ],
            out_specs=pl.BlockSpec((bb, md), lambda b: (b, 0)),
        ),
        compiler_params=pltpu.CompilerParams(
            dimension_semantics=("parallel",),
        ),
    )(mem_flat)

    # Free metadata reshape back to the PyTorch output layout.
    return out_flat.reshape(batch_size, num_memories, dim)


class PersistentMemory:
    """JAX/Pallas port of the data-independent persistent memory module."""

    def __init__(self, dim: int, num_memories: int = 16, *, key=None, dtype=jnp.float32):
        if key is None:
            key = jax.random.PRNGKey(0)
        # Deterministic init mirroring torch.randn(num_memories, dim) * 0.02
        self.memories = jax.random.normal(key, (num_memories, dim), dtype=dtype) * 0.02
        self.num_memories = num_memories
        self.dim = dim

    def __call__(self, batch_size: int) -> jax.Array:
        return persistent_memory_forward(self.memories, batch_size)


if __name__ == "__main__":
    # Small shapes consistent with the module: dim=32, num_memories=16, batch=2
    dim = 32
    num_memories = 16
    batch_size = 2

    key = jax.random.PRNGKey(0)
    module = PersistentMemory(dim=dim, num_memories=num_memories, key=key)

    out = module(batch_size)
    out = jax.block_until_ready(out)

    ref = jnp.broadcast_to(module.memories[None, :, :], (batch_size, num_memories, dim))
    assert out.shape == (batch_size, num_memories, dim), out.shape
    assert out.dtype == module.memories.dtype, out.dtype
    assert bool(jnp.array_equal(out, ref)), "kernel output mismatch vs reference broadcast"

    # Exercise the multi-block (batched-rows-per-step) path as well.
    batch_big = 32
    out_big = persistent_memory_forward(
        module.memories, batch_big, target_block_bytes=8 * 1024  # forces BB=8 -> 4 grid steps
    )
    out_big = jax.block_until_ready(out_big)
    ref_big = jnp.broadcast_to(module.memories[None, :, :], (batch_big, num_memories, dim))
    assert bool(jnp.array_equal(out_big, ref_big)), "multi-block kernel output mismatch"

    print("KERNEL_OK")
</pallas_src>

<mosaic_0001>
module attributes {stable_mosaic.version = 11 : i64} {
  func.func @_persistent_memory_kernel(%arg0: i32, %arg1: memref<1x512xf32, #tpu.memory_space<vmem>>, %arg2: memref<2x512xf32, #tpu.memory_space<vmem>>) attributes {dimension_semantics = [#tpu.dimension_semantics<parallel>], iteration_bounds = array<i64: 1>, scalar_prefetch = 0 : i64, scratch_operands = 0 : i64, tpu.core_type = #tpu.core_type<tc>, window_params = [{pipeline_mode = #tpu.pipeline_mode<synchronous>, transform_indices = @transform_0, window_bounds = array<i64: 1, 512>}, {transform_indices = @transform_1, window_bounds = array<i64: 2, 512>}]} {
    %c0 = arith.constant 0 : index
    %c0_0 = arith.constant 0 : index
    %0 = vector.load %arg1[%c0, %c0_0] : memref<1x512xf32, #tpu.memory_space<vmem>>, vector<1x512xf32>
    %1 = vector.shape_cast %0 : vector<1x512xf32> to vector<1x512xf32>
    %2 = vector.broadcast %1 : vector<1x512xf32> to vector<2x512xf32>
    %c0_1 = arith.constant 0 : index
    %c0_2 = arith.constant 0 : index
    %3 = vector.load %arg2[%c0_1, %c0_2] : memref<2x512xf32, #tpu.memory_space<vmem>>, vector<2x512xf32>
    tpu.vector_store %arg2[%c0_1, %c0_2], %2 {strides = array<i32>} : memref<2x512xf32, #tpu.memory_space<vmem>>, vector<2x512xf32>,
    return
  }
  func.func @transform_0(%arg0: i32) -> (i32, i32) {
    %c0_i32 = arith.constant 0 : i32
    %c0_i32_0 = arith.constant 0 : i32
    %c0_i32_1 = arith.constant 0 : i32
    return %c0_i32, %c0_i32_0 : i32, i32
  }
  func.func @transform_1(%arg0: i32) -> (i32, i32) {
    %c0_i32 = arith.constant 0 : i32
    %c0_i32_0 = arith.constant 0 : i32
    return %arg0, %c0_i32 : i32, i32
  }
}

</mosaic_0001>

<bundles_post_ra>
// kernel: tpu_custom_call.1
= control target key start
LH: loop header
LB: loop body
LE: loop exit
PB: predicated region body
PF: predicated region fallthrough
CT: control target
= control target key end

     0   :  { %6 = vsyncpa [#allocation3], 0  ;;  %s129_s0 = inlined_call_operand.hbm [shape: f32[1,512], index: 0, kind: input, shape index: {}]   ;;  %s130_s1 = inlined_call_operand.hbm [shape: f32[2,512], index: 1, kind: output, shape index: {}]  }
   0x1   :  { %7 = vsyncpa [#allocation4], 0  ;;  %s13_s8 = sshll.u32 %s129_s0, 4  ;;  %s111_s9 = smov [#allocation2]   ;;  %s14_s8 = int_to_ptr.hbm [resolvable:$true] %s13_s8 }
   0x2   :  { %s15_s10 = sshll.u32 %s111_s9, 4  ;;  %s16_s10 = int_to_ptr.vmem [resolvable:$true] %s15_s10 }
   0x3   :  { %18 = dma.hbm_to_vmem [thread:$0]  %s14_s8, 64, %s16_s10, [#allocation3]  }
   0x4   :  { %107 = dma.done.wait [#allocation3], 64  }
   0x5   :  { %108 = vsyncadd [#allocation3], 4294967232  ;;  %v23_v0 = vld [vmem:[#allocation2] sm:$0xf]  ;;  %vm32_vm0 = vcmask 1041408   ;;  %vm34_vm1 = vcmask 1045508  }
   0x6   :  { %v25_v1 = vperm.slane %v23_v0, 0  ;;  %v26_v2 = vperm.slane %v23_v0, 1  ;;  %v27_v3 = vperm.slane %v23_v0, 2  ;;  %v28_v4 = vperm.slane %v23_v0, 3  ;;  %s112_s11 = smov [#allocation5]   ;;  %s47_s0 = sshll.u32 %s130_s1, 4  ;;  %s48_s0 = int_to_ptr.hbm [resolvable:$true] %s47_s0 }
   0x7   :  { %s45_s12 = sshll.u32 %s112_s11, 4  ;;  %vm36_vm2 = vcmask 1043456   ;;  %s46_s12 = int_to_ptr.vmem [resolvable:$true] %s45_s12 }
   0x8   :  { %v29_v5 = vrot.slane %v26_v2, 6  ;;  %v30_v6 = vrot.slane %v27_v3, 4  ;;  %v31_v7 = vrot.slane %v28_v4, 2 }
   0xa   :  { %v33_v8 = vsel %vm32_vm0, %v25_v1, %v29_v5  ;;  %v35_v9 = vsel %vm34_vm1, %v30_v6, %v31_v7 }
   0xb   :  { %v37_v10 = vsel %vm36_vm2, %v33_v8, %v35_v9 }
   0xc   :  { %39 = vst [vmem:[#allocation5] sm:$0xff] %v37_v10 }
   0xd   :  { %50 = dma.vmem_to_hbm [thread:$0]  %s46_s12, 128, %s48_s0, [#allocation4]  }
   0xe   :  { %109 = dma.done.wait [#allocation4], 128  }
   0xf   :  { %110 = vsyncadd [#allocation4], 4294967168 }
  0x10   :  { %55 = vsyncpa [#allocation3], 1 }
  0x11   :  { %56 = vsyncpa [#allocation4], 1 }

</bundles_post_ra>
